<compile_context>
chip_gen: v5e
topology: v5e:2x2
jax: 0.10.0
libtpu: 0.0.40
codegen_flags: <defaults>
</compile_context>

<pallas_src>
import jax
import jax.numpy as jnp
from jax.experimental import pallas as pl
from jax.experimental.pallas import tpu as pltpu

_LANE = 128       # vreg lane width
_SUBLANE = 8      # f32 sublane packing


def _round_up(x, m):
    return ((x + m - 1) // m) * m


def _mlp_kernel(x_ref, w1_ref, b1_ref, w2_ref, b2_ref, o_ref):
    # Cast x to the weight compute dtype *inside* the kernel (no-op on the f32
    # path) — keeps the HBM x stream at its original width.
    x = x_ref[...].astype(w1_ref.dtype)
    # First linear layer: [TM, IN] @ [IN, OUTP] + [1, OUTP], f32 accumulation.
    h = jnp.dot(x, w1_ref[...], preferred_element_type=jnp.float32)
    h = h + b1_ref[...]
    # LeakyReLU with PyTorch default negative_slope = 0.01.
    h = jnp.where(h >= 0, h, 0.01 * h)
    # Second linear layer: [TM, OUTP] @ [OUTP, OUTP] + [1, OUTP].
    out = jnp.dot(h.astype(w2_ref.dtype), w2_ref[...],
                  preferred_element_type=jnp.float32)
    out = out + b2_ref[...]
    o_ref[...] = out.astype(o_ref.dtype)


def pad_params(w1, b1, w2, b2, *, compute_dtype=None):
    """One-time weight/bias preparation (hoisted out of the per-call path).

    w1: [in_feat, out_feat]   b1: [1, out_feat]
    w2: [out_feat, out_feat]  b2: [1, out_feat]

    Only the *output* feature dim is padded to a multiple of 128 (lane-dense
    stores); the contraction dim of w1 keeps the true in_feat so x never needs
    padding.  Zero padding is exact for this network.
    """
    in_feat, out_feat = w1.shape
    out_p = _round_up(out_feat, _LANE)

    w1p = jnp.zeros((in_feat, out_p), jnp.float32).at[:, :out_feat].set(
        w1.astype(jnp.float32))
    b1p = jnp.zeros((1, out_p), jnp.float32).at[:, :out_feat].set(
        b1.astype(jnp.float32))
    w2p = jnp.zeros((out_p, out_p), jnp.float32).at[:out_feat, :out_feat].set(
        w2.astype(jnp.float32))
    b2p = jnp.zeros((1, out_p), jnp.float32).at[:, :out_feat].set(
        b2.astype(jnp.float32))

    if compute_dtype is not None:
        # Resident operands only; x is cast in-kernel, biases stay f32.
        w1p = w1p.astype(compute_dtype)
        w2p = w2p.astype(compute_dtype)

    return (w1p, b1p, w2p, b2p, out_feat)


def _pick_tile(B, in_cols, out_cols, x_itemsize, *, max_tile=1024,
               vmem_budget_bytes=16 * 1024 * 1024):
    """Batch tile: as large as the VMEM budget allows (up to max_tile rows),
    but capped so the grid has >= 2 steps whenever B allows it (v7x has 2
    TensorCores sharding the "parallel" grid axis)."""
    # Per-row VMEM of the streamed operands: double-buffered x block,
    # double-buffered out block, plus the f32 h temp.
    per_row = 2 * in_cols * x_itemsize + 2 * out_cols * 4 + out_cols * 4
    budget_tile = max(_SUBLANE, (vmem_budget_bytes // per_row) // _SUBLANE * _SUBLANE)
    cap = min(max_tile, budget_tile)
    if B <= _SUBLANE:
        return _SUBLANE
    half = _round_up(pl.cdiv(B, 2), _SUBLANE)   # keep >= 2 grid steps
    return max(_SUBLANE, min(cap, half))


def leaky_relu_net(x, padded_params, *, out_dtype=None, max_tile=1024):
    """Fused forward pass of LeakyReLUNet.

    x:             [B, in_feat] (f32, or anything castable; cast happens in-kernel)
    padded_params: output of pad_params()
    out_dtype:     optional output dtype (e.g. jnp.bfloat16 to halve writeback
                   bytes on v6e/v7x); defaults to x.dtype.
    returns [B, out_feat]
    """
    w1p, b1p, w2p, b2p, out_feat = padded_params
    B, in_feat = x.shape
    assert w1p.shape[0] == in_feat, "x feature dim must match w1"
    out_p = w1p.shape[1]
    out_dtype = x.dtype if out_dtype is None else out_dtype

    tm = _pick_tile(B, in_feat, out_p, x.dtype.itemsize, max_tile=max_tile)
    grid = (pl.cdiv(B, tm),)   # ragged last block handled by overhang:
    #   OOB rows of the last x block read garbage, their output rows are
    #   clipped on writeback, valid rows are unaffected.

    weight_bytes = ((in_feat + out_p) * out_p + 2 * out_p) * w1p.dtype.itemsize
    cost = pl.CostEstimate(
        flops=2 * B * out_p * (in_feat + out_p),
        transcendentals=0,
        bytes_accessed=(B * in_feat * x.dtype.itemsize
                        + B * out_p * jnp.dtype(out_dtype).itemsize
                        + weight_bytes),
    )

    out_padded = pl.pallas_call(
        _mlp_kernel,
        out_shape=jax.ShapeDtypeStruct((B, out_p), out_dtype),
        grid=grid,
        in_specs=[
            # x: batch-tiled; feature axis uses the full-dim exception so no
            # wrapper pad is needed even when in_feat is not a 128 multiple.
            pl.BlockSpec((tm, in_feat), lambda i: (i, 0)),
            pl.BlockSpec((in_feat, out_p), lambda i: (0, 0)),  # w1: resident
            pl.BlockSpec((1, out_p), lambda i: (0, 0)),        # b1: resident
            pl.BlockSpec((out_p, out_p), lambda i: (0, 0)),    # w2: resident
            pl.BlockSpec((1, out_p), lambda i: (0, 0)),        # b2: resident
        ],
        out_specs=pl.BlockSpec((tm, out_p), lambda i: (i, 0)),
        compiler_params=pltpu.CompilerParams(
            dimension_semantics=("parallel",),   # batch rows are independent
        ),
        cost_estimate=cost,
    )(x, w1p, b1p, w2p, b2p)

    if out_p == out_feat:
        return out_padded          # already lane-dense and unpadded: no slice pass
    return out_padded[:, :out_feat]


def init_params(key, in_feat, out_feat):
    """Deterministic init matching nn.Linear shapes (uniform +-1/sqrt(fan_in))."""
    k1, k2, k3, k4 = jax.random.split(key, 4)
    bound1 = 1.0 / jnp.sqrt(in_feat)
    bound2 = 1.0 / jnp.sqrt(out_feat)
    w1 = jax.random.uniform(k1, (in_feat, out_feat), jnp.float32, -bound1, bound1)
    b1 = jax.random.uniform(k2, (1, out_feat), jnp.float32, -bound1, bound1)
    w2 = jax.random.uniform(k3, (out_feat, out_feat), jnp.float32, -bound2, bound2)
    b2 = jax.random.uniform(k4, (1, out_feat), jnp.float32, -bound2, bound2)
    return w1, b1, w2, b2


def _reference(x, w1, b1, w2, b2):
    h = x @ w1 + b1
    h = jnp.where(h >= 0, h, 0.01 * h)
    return h @ w2 + b2


if __name__ == "__main__":
    key = jax.random.PRNGKey(0)
    kx, kx2, kp = jax.random.split(key, 3)

    in_feat, out_feat = 32, 32
    w1, b1, w2, b2 = init_params(kp, in_feat, out_feat)

    # One-time padded params (f32 path and bf16-compute path).
    params_f32 = pad_params(w1, b1, w2, b2)
    params_bf16 = pad_params(w1, b1, w2, b2, compute_dtype=jnp.bfloat16)

    # Small, tm-divisible batch: single grid step.
    x = jax.random.normal(kx, (8, in_feat), jnp.float32)
    out = jax.block_until_ready(leaky_relu_net(x, params_f32))
    ref = _reference(x, w1, b1, w2, b2)
    assert out.shape == (8, out_feat)
    assert jnp.allclose(out, ref, atol=1e-5, rtol=1e-5)

    # Ragged batch: exercises >=2 grid steps and the overhang last block.
    x2 = jax.random.normal(kx2, (20, in_feat), jnp.float32)
    out2 = jax.block_until_ready(leaky_relu_net(x2, params_f32))
    ref2 = _reference(x2, w1, b1, w2, b2)
    assert out2.shape == (20, out_feat)
    assert jnp.allclose(out2, ref2, atol=1e-5, rtol=1e-5)

    # bf16 MXU path (x cast in-kernel, weights pre-cast) — looser tolerance.
    out_bf16 = jax.block_until_ready(leaky_relu_net(x2, params_bf16))
    assert jnp.allclose(out_bf16, ref2, atol=5e-2, rtol=5e-2)

    print("KERNEL_OK")
</pallas_src>

<mosaic_0001>
module attributes {stable_mosaic.version = 11 : i64} {
  func.func @_mlp_kernel(%arg0: i32, %arg1: memref<8x32xf32, #tpu.memory_space<vmem>>, %arg2: memref<32x128xf32, #tpu.memory_space<vmem>>, %arg3: memref<1x128xf32, #tpu.memory_space<vmem>>, %arg4: memref<128x128xf32, #tpu.memory_space<vmem>>, %arg5: memref<1x128xf32, #tpu.memory_space<vmem>>, %arg6: memref<8x128xf32, #tpu.memory_space<vmem>>) attributes {dimension_semantics = [#tpu.dimension_semantics<parallel>], iteration_bounds = array<i64: 1>, scalar_prefetch = 0 : i64, scratch_operands = 0 : i64, tpu.core_type = #tpu.core_type<tc>, window_params = [{transform_indices = @transform_0, window_bounds = array<i64: 8, 32>}, {pipeline_mode = #tpu.pipeline_mode<synchronous>, transform_indices = @transform_1, window_bounds = array<i64: 32, 128>}, {pipeline_mode = #tpu.pipeline_mode<synchronous>, transform_indices = @transform_2, window_bounds = array<i64: 1, 128>}, {pipeline_mode = #tpu.pipeline_mode<synchronous>, transform_indices = @transform_3, window_bounds = array<i64: 128, 128>}, {pipeline_mode = #tpu.pipeline_mode<synchronous>, transform_indices = @transform_4, window_bounds = array<i64: 1, 128>}, {transform_indices = @transform_5, window_bounds = array<i64: 8, 128>}]} {
    %c0 = arith.constant 0 : index
    %c0_0 = arith.constant 0 : index
    %0 = vector.load %arg1[%c0, %c0_0] : memref<8x32xf32, #tpu.memory_space<vmem>>, vector<8x32xf32>
    %c0_1 = arith.constant 0 : index
    %c0_2 = arith.constant 0 : index
    %1 = vector.load %arg2[%c0_1, %c0_2] : memref<32x128xf32, #tpu.memory_space<vmem>>, vector<32x128xf32>
    %cst = arith.constant dense<0.000000e+00> : vector<8x128xf32>
    %2 = tpu.matmul %0, %1, %cst {dimension_numbers = #tpu.dot_dimension_numbers<[1], [0], [0], [1], [0, 0, 1, 1], [], []>} : vector<8x32xf32>, vector<32x128xf32>, vector<8x128xf32> -> vector<8x128xf32>
    %c0_3 = arith.constant 0 : index
    %c0_4 = arith.constant 0 : index
    %3 = vector.load %arg3[%c0_3, %c0_4] : memref<1x128xf32, #tpu.memory_space<vmem>>, vector<1x128xf32>
    %4 = vector.broadcast %3 : vector<1x128xf32> to vector<8x128xf32>
    %5 = arith.addf %2, %4 : vector<8x128xf32>
    %cst_5 = arith.constant 0.000000e+00 : f32
    %6 = vector.broadcast %cst_5 : f32 to vector<8x128xf32>
    %7 = arith.cmpf oge, %5, %6 : vector<8x128xf32>
    %cst_6 = arith.constant 0.00999999977 : f32
    %8 = vector.broadcast %cst_6 : f32 to vector<8x128xf32>
    %9 = arith.mulf %8, %5 : vector<8x128xf32>
    %10 = arith.select %7, %5, %9 : vector<8x128xi1>, vector<8x128xf32>
    %c0_7 = arith.constant 0 : index
    %c0_8 = arith.constant 0 : index
    %11 = vector.load %arg4[%c0_7, %c0_8] : memref<128x128xf32, #tpu.memory_space<vmem>>, vector<128x128xf32>
    %cst_9 = arith.constant dense<0.000000e+00> : vector<8x128xf32>
    %12 = tpu.matmul %10, %11, %cst_9 {dimension_numbers = #tpu.dot_dimension_numbers<[1], [0], [0], [1], [0, 0, 1, 1], [], []>} : vector<8x128xf32>, vector<128x128xf32>, vector<8x128xf32> -> vector<8x128xf32>
    %c0_10 = arith.constant 0 : index
    %c0_11 = arith.constant 0 : index
    %13 = vector.load %arg5[%c0_10, %c0_11] : memref<1x128xf32, #tpu.memory_space<vmem>>, vector<1x128xf32>
    %14 = vector.broadcast %13 : vector<1x128xf32> to vector<8x128xf32>
    %15 = arith.addf %12, %14 : vector<8x128xf32>
    %c0_12 = arith.constant 0 : index
    %c0_13 = arith.constant 0 : index
    %16 = vector.load %arg6[%c0_12, %c0_13] : memref<8x128xf32, #tpu.memory_space<vmem>>, vector<8x128xf32>
    tpu.vector_store %arg6[%c0_12, %c0_13], %15 {strides = array<i32>} : memref<8x128xf32, #tpu.memory_space<vmem>>, vector<8x128xf32>,
    return
  }
  func.func @transform_0(%arg0: i32) -> (i32, i32) {
    %c0_i32 = arith.constant 0 : i32
    %c0_i32_0 = arith.constant 0 : i32
    return %arg0, %c0_i32 : i32, i32
  }
  func.func @transform_1(%arg0: i32) -> (i32, i32) {
    %c0_i32 = arith.constant 0 : i32
    %c0_i32_0 = arith.constant 0 : i32
    %c0_i32_1 = arith.constant 0 : i32
    return %c0_i32, %c0_i32_0 : i32, i32
  }
  func.func @transform_2(%arg0: i32) -> (i32, i32) {
    %c0_i32 = arith.constant 0 : i32
    %c0_i32_0 = arith.constant 0 : i32
    %c0_i32_1 = arith.constant 0 : i32
    return %c0_i32, %c0_i32_0 : i32, i32
  }
  func.func @transform_3(%arg0: i32) -> (i32, i32) {
    %c0_i32 = arith.constant 0 : i32
    %c0_i32_0 = arith.constant 0 : i32
    %c0_i32_1 = arith.constant 0 : i32
    return %c0_i32, %c0_i32_0 : i32, i32
  }
  func.func @transform_4(%arg0: i32) -> (i32, i32) {
    %c0_i32 = arith.constant 0 : i32
    %c0_i32_0 = arith.constant 0 : i32
    %c0_i32_1 = arith.constant 0 : i32
    return %c0_i32, %c0_i32_0 : i32, i32
  }
  func.func @transform_5(%arg0: i32) -> (i32, i32) {
    %c0_i32 = arith.constant 0 : i32
    %c0_i32_0 = arith.constant 0 : i32
    return %arg0, %c0_i32 : i32, i32
  }
}

</mosaic_0001>

<bundles_post_ra>
// kernel: tpu_custom_call.1
= control target key start
LH: loop header
LB: loop body
LE: loop exit
PB: predicated region body
PF: predicated region fallthrough
CT: control target
= control target key end

     0   :  { %10 = vsyncpa [#allocation3], 0  ;;  %s326_s0 = inlined_call_operand.hbm [shape: f32[8,32], index: 0, kind: input, shape index: {}]   ;;  %s327_s1 = inlined_call_operand.hbm [shape: f32[32,128], index: 1, kind: input, shape index: {}]   ;;  %s328_s2 = inlined_call_operand.vmem [shape: f32[1,128], index: 2, kind: input, shape index: {}]   ;;  %s329_s3 = inlined_call_operand.hbm [shape: f32[128,128], index: 3, kind: input, shape index: {}]   ;;  %s330_s4 = inlined_call_operand.vmem [shape: f32[1,128], index: 4, kind: input, shape index: {}]   ;;  %s331_s5 = inlined_call_operand.hbm [shape: f32[8,128], index: 5, kind: output, shape index: {}]  }
   0x1   :  { %11 = vsyncpa [#allocation6], 0  ;;  %s28_s20 = sshll.u32 %s327_s1, 4  ;;  %s29_s20 = int_to_ptr.hbm [resolvable:$true] %s28_s20 }
   0x2   :  { %12 = vsyncpa [#allocation4], 0  ;;  %s272_s21 = smov [#allocation5]   ;;  %s18_s25 = sshll.u32 %s326_s0, 4  ;;  %s19_s25 = int_to_ptr.hbm [resolvable:$true] %s18_s25 }
   0x3   :  { %s30_s22 = sshll.u32 %s272_s21, 4  ;;  %s273_s26 = smov 128   ;;  %s31_s22 = int_to_ptr.vmem [resolvable:$true] %s30_s22 }
   0x4   :  { %s274_s27 = smov 8   ;;  %s275_s28 = smov [#allocation2]  }
   0x5   :  { %36 = dma.hbm_to_vmem [thread:$0]  %s29_s20, 512, %s31_s22, [#allocation6], %s273_s26, %s273_s26, %s274_s27  }
   0x6   :  { %s20_s29 = sshll.u32 %s275_s28, 4  ;;  %s43_s7 = sshll.u32 %s329_s3, 4  ;;  %s21_s29 = int_to_ptr.vmem [resolvable:$true] %s20_s29  ;;  %s44_s7 = int_to_ptr.hbm [resolvable:$true] %s43_s7 }
   0x7   :  { %23 = dma.hbm_to_vmem [thread:$0]  %s19_s25, 128, %s21_s29, [#allocation3]  }
   0x8   :  { %s276_s1 = smov [#allocation7]  }
   0x9   :  { %s45_s8 = sshll.u32 %s276_s1, 4  ;;  %s46_s8 = int_to_ptr.vmem [resolvable:$true] %s45_s8 }
   0xa   :  { %51 = dma.hbm_to_vmem [thread:$0]  %s44_s7, 2048, %s46_s8, [#allocation6], %s273_s26, %s273_s26, %s274_s27  }
   0xb   :  { %266 = dma.done.wait [#allocation3], 128  }
   0xc   :  { %267 = vsyncadd [#allocation3], 4294967168 }
   0xd   :  { %268 = dma.done.wait [#allocation6], 2560  }
   0xe   :  { %269 = vsyncadd [#allocation6], 4294964736  ;;  %v70_v0 = vld [vmem:[#allocation5 + $0x18] sm:$0xff]  ;;  %v69_v1 = vld [vmem:[#allocation5 + $0x10] sm:$0xff]  ;;  %vm75_vm0 = vcmask 261120   ;;  %s277_s11 = smov [#allocation8]  }
   0xf   :  { %91 = vmatpush.msra.mxu0 %v70_v0  ;;  %v117_v2 = vld [vmem:[#allocation7 + $0x78] sm:$0xff]  ;;  %v68_v3 = vld [vmem:[#allocation5 + $0x8] sm:$0xff]  ;;  %v116_v4 = vld [vmem:[#allocation7 + $0x70] sm:$0xff]  ;;  %s148_s12 = sshll.u32 %s277_s11, 4  ;;  %s150_s15 = sshll.u32 %s331_s5, 4  ;;  %s149_s12 = int_to_ptr.vmem [resolvable:$true] %s148_s12  ;;  %s151_s15 = int_to_ptr.hbm [resolvable:$true] %s150_s15 }
  0x10   :  { %122 = vmatpush.msra.mxu1 %v117_v2  ;;  %v115_v5 = vld [vmem:[#allocation7 + $0x68] sm:$0xff]  ;;  %v67_v6 = vld [vmem:[#allocation5] sm:$0xff]  ;;  %v66_v7 = vld [vmem:[#allocation2] sm:$0xff] }
  0x11   :  { %92 = vmatpush.msra.mxu0 %v69_v1  ;;  %v114_v8 = vld [vmem:[#allocation7 + $0x60] sm:$0xff]  ;;  %v113_v9 = vld [vmem:[#allocation7 + $0x58] sm:$0xff]  ;;  %v112_v10 = vld [vmem:[#allocation7 + $0x50] sm:$0xff] }
  0x12   :  { %123 = vmatpush.msra.mxu1 %v116_v4  ;;  %v111_v11 = vld [vmem:[#allocation7 + $0x48] sm:$0xff]  ;;  %v110_v12 = vld [vmem:[#allocation7 + $0x40] sm:$0xff]  ;;  %v109_v13 = vld [vmem:[#allocation7 + $0x38] sm:$0xff] }
  0x13   :  { %93 = vmatpush.msra.mxu0 %v68_v3  ;;  %v108_v14 = vld [vmem:[#allocation7 + $0x30] sm:$0xff]  ;;  %v107_v15 = vld [vmem:[#allocation7 + $0x28] sm:$0xff]  ;;  %v106_v16 = vld [vmem:[#allocation7 + $0x20] sm:$0xff] }
  0x14   :  { %124 = vmatpush.msra.mxu1 %v115_v5  ;;  %v105_v17 = vld [vmem:[#allocation7 + $0x18] sm:$0xff]  ;;  %v104_v18 = vld [vmem:[#allocation7 + $0x10] sm:$0xff]  ;;  %v103_v19 = vld [vmem:[#allocation7 + $0x8] sm:$0xff] }
  0x15   :  { %94 = vmatpush.msra.mxu0 %v67_v6  ;;  %v102_v20 = vld [vmem:[#allocation7] sm:$0xff]  ;;  %v168_v21 = vld [vmem:[%s328_s2] ss:$0 sm:$0xff] }
  0x16   :  { %161 = vmatmul.msk.f32.vlgmr.msra.gmra.mxu0 %vm75_vm0, %v66_v7  ;;  %125 = vmatpush.msra.mxu1 %v114_v8  ;;  %v169_v26 = vld [vmem:[%s330_s4] ss:$0 sm:$0xff] }
  0x18   :  { %126 = vmatpush.msra.mxu1 %v113_v9 }
  0x1a   :  { %127 = vmatpush.msra.mxu1 %v112_v10 }
  0x1c   :  { %128 = vmatpush.msra.mxu1 %v111_v11 }
  0x1e   :  { %129 = vmatpush.msra.mxu1 %v110_v12 }
  0x20   :  { %130 = vmatpush.msra.mxu1 %v109_v13 }
  0x22   :  { %131 = vmatpush.msra.mxu1 %v108_v14 }
  0x24   :  { %132 = vmatpush.msra.mxu1 %v107_v15 }
  0x26   :  { %133 = vmatpush.msra.mxu1 %v106_v16 }
  0x28   :  { %134 = vmatpush.msra.mxu1 %v105_v17 }
  0x2a   :  { %135 = vmatpush.msra.mxu1 %v104_v18 }
  0x2c   :  { %136 = vmatpush.msra.mxu1 %v103_v19 }
  0x2e   :  { %137 = vmatpush.msra.mxu1 %v102_v20 }
  0x93   :  { %v96_v22 = vpop.f32.mrf.mxu0 }
  0x94   :  { %v97_v23 = vadd.f32 %v168_v21, %v96_v22 }
  0x96   :  { %vm99_vm1 = vcmp.ge.f32.partialorder %v97_v23, 0.0  ;;  %v100_v24 = vmul.f32 0.01, %v97_v23 }
  0x98   :  { %v101_v25 = vsel %vm99_vm1, %v97_v23, %v100_v24 }
  0x99   :  { %138 = vmatmul.f32.vlgmr.msra.gmra.mxu1 %v101_v25 }
 0x116   :  { %v139_v27 = vpop.f32.mrf.mxu1 }
 0x117   :  { %v140_v28 = vadd.f32 %v169_v26, %v139_v27 }
 0x119   :  { %142 = vst [vmem:[#allocation8] sm:$0xff] %v140_v28 }
 0x11a   :  { %153 = dma.vmem_to_hbm [thread:$0]  %s149_s12, 128, %s151_s15, [#allocation4]  }
 0x11b   :  { %270 = dma.done.wait [#allocation4], 128  }
 0x11c   :  { %271 = vsyncadd [#allocation4], 4294967168 }
 0x11d   :  { %158 = vsyncpa [#allocation3], 1 }
 0x11e   :  { %159 = vsyncpa [#allocation6], 1 }
 0x11f   :  { %160 = vsyncpa [#allocation4], 1 }

</bundles_post_ra>
